<compile_context>
chip_gen: v5e
topology: v5e:2x2
jax: 0.10.0
libtpu: 0.0.40
codegen_flags: <defaults>
</compile_context>

<pallas_src>
import functools

import jax
import jax.numpy as jnp
import numpy as np
from jax.experimental import pallas as pl
from jax.experimental.pallas import tpu as pltpu

BN_EPS = 1e-4                      # nn.BatchNorm2d(..., eps=0.0001)
_VMEM_LIMIT = 32 * 1024 * 1024     # explicit scoped-VMEM budget (v5e/v6e/v7x safe)


# ------------------------------ kernel helpers ------------------------------

def _elu(x):
    # ELU(alpha=1): x if x > 0 else exp(x) - 1.  Clamp the exp argument so the
    # discarded positive branch can never overflow to inf.
    return jnp.where(x > 0, x, jnp.exp(jnp.minimum(x, 0.0)) - 1.0)


def _masked(vals, tm, m_valid, mask_rows):
    """Zero out rows >= m_valid (padding rows) for the BN stat accumulation."""
    if not mask_rows:
        return vals
    row0 = pl.program_id(0) * tm
    rid = jax.lax.broadcasted_iota(jnp.int32, vals.shape, 0) + row0
    return vals * (rid < m_valid).astype(vals.dtype)


# --------------------------------- kernels -----------------------------------

def _stage1_kernel(p_ref, w1_ref, b1_ref, w3_ref, b3_ref,
                   c1_ref, skip_ref, s1_ref, q1_ref, *, tm, m_valid, mask_rows):
    """conv1 & conv3 on a shared stride-2 im2col tile + BN1 stat accumulation."""
    p = p_ref[...]                                                    # (TM, 9*Cin) bf16
    c1 = jnp.dot(p, w1_ref[...], preferred_element_type=jnp.float32) + b1_ref[...]
    sk = jnp.dot(p, w3_ref[...], preferred_element_type=jnp.float32) + b3_ref[...]
    c1_ref[...] = c1
    skip_ref[...] = sk

    @pl.when(pl.program_id(0) == 0)
    def _():
        s1_ref[...] = jnp.zeros_like(s1_ref)
        q1_ref[...] = jnp.zeros_like(q1_ref)

    c1m = _masked(c1, tm, m_valid, mask_rows)
    s1_ref[...] += jnp.sum(c1m, axis=0, keepdims=True)
    q1_ref[...] += jnp.sum(c1m * c1, axis=0, keepdims=True)   # masked * unmasked = masked x^2


def _stage2_kernel(p2_ref, w2_ref, b2_ref, skip_ref,
                   y_ref, s2_ref, q2_ref, *, tm, m_valid, mask_rows):
    """conv2 on stride-1 patches of h + bias + residual skip + BN2 stat accumulation."""
    y = (jnp.dot(p2_ref[...], w2_ref[...], preferred_element_type=jnp.float32)
         + b2_ref[...] + skip_ref[...])
    y_ref[...] = y

    @pl.when(pl.program_id(0) == 0)
    def _():
        s2_ref[...] = jnp.zeros_like(s2_ref)
        q2_ref[...] = jnp.zeros_like(q2_ref)

    ym = _masked(y, tm, m_valid, mask_rows)
    s2_ref[...] += jnp.sum(ym, axis=0, keepdims=True)
    q2_ref[...] += jnp.sum(ym * y, axis=0, keepdims=True)


def _affine_elu_kernel(x_ref, scale_ref, shift_ref, o_ref):
    """Apply folded BatchNorm affine (scale, shift) + ELU; math in f32."""
    y = x_ref[...].astype(jnp.float32) * scale_ref[...] + shift_ref[...]
    o_ref[...] = _elu(y).astype(o_ref.dtype)


# ------------------------------ pallas_call wrappers --------------------------

def _run_stage1(P, w1, b1, w3, b3, tm, m_valid):
    m_pad, k1 = P.shape
    cmid = w1.shape[1]
    cout = w3.shape[1]
    kernel = functools.partial(_stage1_kernel, tm=tm, m_valid=m_valid,
                               mask_rows=(m_pad != m_valid))
    return pl.pallas_call(
        kernel,
        grid=(m_pad // tm,),
        in_specs=[pl.BlockSpec((tm, k1), lambda i: (i, 0)),      # patches (tiled)
                  pl.BlockSpec((k1, cmid), lambda i: (0, 0)),    # W1 (resident)
                  pl.BlockSpec((1, cmid), lambda i: (0, 0)),     # b1
                  pl.BlockSpec((k1, cout), lambda i: (0, 0)),    # W3 (resident)
                  pl.BlockSpec((1, cout), lambda i: (0, 0))],    # b3
        out_specs=[pl.BlockSpec((tm, cmid), lambda i: (i, 0)),   # conv1 pre-BN
                   pl.BlockSpec((tm, cout), lambda i: (i, 0)),   # skip
                   pl.BlockSpec((1, cmid), lambda i: (0, 0)),    # sum accumulator
                   pl.BlockSpec((1, cmid), lambda i: (0, 0))],   # sumsq accumulator
        out_shape=(jax.ShapeDtypeStruct((m_pad, cmid), jnp.float32),
                   jax.ShapeDtypeStruct((m_pad, cout), jnp.float32),
                   jax.ShapeDtypeStruct((1, cmid), jnp.float32),
                   jax.ShapeDtypeStruct((1, cmid), jnp.float32)),
        compiler_params=pltpu.CompilerParams(
            dimension_semantics=("arbitrary",),   # stat accumulation over M
            vmem_limit_bytes=_VMEM_LIMIT),
    )(P, w1, b1, w3, b3)


def _run_stage2(P2, w2, b2, skip, tm, m_valid):
    m_pad, k2 = P2.shape
    cout = w2.shape[1]
    kernel = functools.partial(_stage2_kernel, tm=tm, m_valid=m_valid,
                               mask_rows=(m_pad != m_valid))
    return pl.pallas_call(
        kernel,
        grid=(m_pad // tm,),
        in_specs=[pl.BlockSpec((tm, k2), lambda i: (i, 0)),      # patches of h (tiled)
                  pl.BlockSpec((k2, cout), lambda i: (0, 0)),    # W2 (resident)
                  pl.BlockSpec((1, cout), lambda i: (0, 0)),     # b2
                  pl.BlockSpec((tm, cout), lambda i: (i, 0))],   # skip (tiled)
        out_specs=[pl.BlockSpec((tm, cout), lambda i: (i, 0)),   # y pre-BN
                   pl.BlockSpec((1, cout), lambda i: (0, 0)),
                   pl.BlockSpec((1, cout), lambda i: (0, 0))],
        out_shape=(jax.ShapeDtypeStruct((m_pad, cout), jnp.float32),
                   jax.ShapeDtypeStruct((1, cout), jnp.float32),
                   jax.ShapeDtypeStruct((1, cout), jnp.float32)),
        compiler_params=pltpu.CompilerParams(
            dimension_semantics=("arbitrary",),
            vmem_limit_bytes=_VMEM_LIMIT),
    )(P2, w2, b2, skip)


def _run_affine_elu(x, scale, shift, tm, out_dtype):
    m_pad, c = x.shape
    return pl.pallas_call(
        _affine_elu_kernel,
        grid=(m_pad // tm,),
        in_specs=[pl.BlockSpec((tm, c), lambda i: (i, 0)),
                  pl.BlockSpec((1, c), lambda i: (0, 0)),
                  pl.BlockSpec((1, c), lambda i: (0, 0))],
        out_specs=pl.BlockSpec((tm, c), lambda i: (i, 0)),
        out_shape=jax.ShapeDtypeStruct((m_pad, c), out_dtype),
        compiler_params=pltpu.CompilerParams(
            dimension_semantics=("parallel",),    # independent rows -> megacore on v7x
            vmem_limit_bytes=_VMEM_LIMIT),
    )(x, scale, shift)


# ----------------------------------- glue -------------------------------------

def _im2col(x_nhwc, k, stride):
    """Plain-JAX im2col (kept in the input dtype, here bf16).

    Returns ((N*Ho*Wo, k*k*C), Ho, Wo); column order (kh, kw, cin) matches
    w_hwio.reshape(k*k*Cin, Cout).
    """
    N, H, W, C = x_nhwc.shape
    pad = k // 2
    xp = jnp.pad(x_nhwc, ((0, 0), (pad, pad), (pad, pad), (0, 0)))
    Ho = (H + 2 * pad - k) // stride + 1
    Wo = (W + 2 * pad - k) // stride + 1
    cols = []
    for kh in range(k):
        for kw in range(k):
            patch = jax.lax.slice(
                xp,
                (0, kh, kw, 0),
                (N, kh + (Ho - 1) * stride + 1, kw + (Wo - 1) * stride + 1, C),
                (1, stride, stride, 1))
            cols.append(patch)
    P = jnp.concatenate(cols, axis=-1)
    return P.reshape(N * Ho * Wo, k * k * C), Ho, Wo


def _round_up(a, b):
    return (a + b - 1) // b * b


def _choose_tile_m(m, target):
    tm = min(target, _round_up(m, 8))
    return max(8, (tm // 8) * 8)


def resdown_forward(x_nchw, params, kernel_size=3, tile_m=512):
    """ResDown.forward. x_nchw: (N, Cin, H, W) -> (N, Cout, H//2, W//2)."""
    x = jnp.transpose(x_nchw, (0, 2, 3, 1)).astype(jnp.bfloat16)   # NHWC bf16
    N = x.shape[0]
    k = kernel_size
    cmid = params["w1"].shape[1]
    cout = params["w2"].shape[1]

    w1 = params["w1"].astype(jnp.bfloat16)
    w2 = params["w2"].astype(jnp.bfloat16)
    w3 = params["w3"].astype(jnp.bfloat16)
    b1 = params["b1"].astype(jnp.float32)
    b2 = params["b2"].astype(jnp.float32)
    b3 = params["b3"].astype(jnp.float32)

    # ---- Stage 1: conv1 & conv3 share the stride-2 patch matrix of x ----
    P, Ho, Wo = _im2col(x, k, stride=2)
    M = P.shape[0]
    tm = _choose_tile_m(M, tile_m)
    m_pad = _round_up(M, tm)
    if m_pad != M:
        P = jnp.pad(P, ((0, m_pad - M), (0, 0)))

    c1, skip, s1, q1 = _run_stage1(P, w1, b1, w3, b3, tm, M)

    # Fold training-mode BN1 (global batch stats over the true M rows) into an affine.
    mean1 = s1 / M
    var1 = jnp.maximum(q1 / M - mean1 * mean1, 0.0)
    scale1 = params["g1"] * jax.lax.rsqrt(var1 + BN_EPS)
    shift1 = params["be1"] - mean1 * scale1
    h = _run_affine_elu(c1, scale1.astype(jnp.float32), shift1.astype(jnp.float32),
                        tm, jnp.bfloat16)                          # (m_pad, Cmid) bf16

    # ---- Stage 2: conv2 (stride 1) on stage-1 activations + skip + BN2 + ELU ----
    h_nhwc = h[:M].reshape(N, Ho, Wo, cmid)
    P2, _, _ = _im2col(h_nhwc, k, stride=1)
    if m_pad != M:
        P2 = jnp.pad(P2, ((0, m_pad - M), (0, 0)))

    y, s2, q2 = _run_stage2(P2, w2, b2, skip, tm, M)
    mean2 = s2 / M
    var2 = jnp.maximum(q2 / M - mean2 * mean2, 0.0)
    scale2 = params["g2"] * jax.lax.rsqrt(var2 + BN_EPS)
    shift2 = params["be2"] - mean2 * scale2
    out = _run_affine_elu(y, scale2.astype(jnp.float32), shift2.astype(jnp.float32),
                          tm, jnp.float32)

    out = out[:M].reshape(N, Ho, Wo, cout)
    return jnp.transpose(out, (0, 3, 1, 2))                        # back to NCHW


# --------------------------- pure-JAX f32 reference -----------------------------

def _ref_forward(x_nchw, p):
    x = jnp.transpose(x_nchw, (0, 2, 3, 1))

    def conv(x, w_hwio, b, stride):
        y = jax.lax.conv_general_dilated(
            x, w_hwio, (stride, stride), ((1, 1), (1, 1)),
            dimension_numbers=("NHWC", "HWIO", "NHWC"))
        return y + b

    def bn(x, g, be):
        mean = jnp.mean(x, axis=(0, 1, 2), keepdims=True)
        var = jnp.mean((x - mean) ** 2, axis=(0, 1, 2), keepdims=True)
        return (x - mean) * jax.lax.rsqrt(var + BN_EPS) * g + be

    def elu(x):
        return jnp.where(x > 0, x, jnp.exp(jnp.minimum(x, 0.0)) - 1.0)

    skip = conv(x, p["w3_hwio"], p["b3"][0], 2)
    h = elu(bn(conv(x, p["w1_hwio"], p["b1"][0], 2), p["g1"][0], p["be1"][0]))
    y = conv(h, p["w2_hwio"], p["b2"][0], 1)
    out = elu(bn(y + skip, p["g2"][0], p["be2"][0]))
    return jnp.transpose(out, (0, 3, 1, 2))


# ------------------------------------ main --------------------------------------

if __name__ == "__main__":
    key = jax.random.PRNGKey(0)
    N, Cin, H, W = 2, 4, 16, 16
    Cout = 8
    Cmid = Cout // 2
    k = 3

    keys = jax.random.split(key, 11)
    x = jax.random.normal(keys[0], (N, Cin, H, W), jnp.float32)

    # Deterministic synthetic parameters (HWIO conv weights).
    w1_hwio = 0.2 * jax.random.normal(keys[1], (k, k, Cin, Cmid), jnp.float32)
    b1 = 0.1 * jax.random.normal(keys[2], (1, Cmid), jnp.float32)
    w2_hwio = 0.2 * jax.random.normal(keys[3], (k, k, Cmid, Cout), jnp.float32)
    b2 = 0.1 * jax.random.normal(keys[4], (1, Cout), jnp.float32)
    w3_hwio = 0.2 * jax.random.normal(keys[5], (k, k, Cin, Cout), jnp.float32)
    b3 = 0.1 * jax.random.normal(keys[6], (1, Cout), jnp.float32)
    g1 = 1.0 + 0.1 * jax.random.normal(keys[7], (1, Cmid), jnp.float32)
    be1 = 0.1 * jax.random.normal(keys[8], (1, Cmid), jnp.float32)
    g2 = 1.0 + 0.1 * jax.random.normal(keys[9], (1, Cout), jnp.float32)
    be2 = 0.1 * jax.random.normal(keys[10], (1, Cout), jnp.float32)

    params = dict(
        w1=w1_hwio.reshape(k * k * Cin, Cmid), b1=b1,
        w2=w2_hwio.reshape(k * k * Cmid, Cout), b2=b2,
        w3=w3_hwio.reshape(k * k * Cin, Cout), b3=b3,
        g1=g1, be1=be1, g2=g2, be2=be2,
    )

    # tile_m=48 exercises the multi-tile + ragged-last-tile (masked stats) paths
    # at this small demo size; real sizes use the default 512-row tiles.
    out = resdown_forward(x, params, k, tile_m=48)
    out = jax.block_until_ready(out)
    assert out.shape == (N, Cout, H // 2, W // 2), out.shape

    ref = _ref_forward(x, dict(params, w1_hwio=w1_hwio, w2_hwio=w2_hwio,
                               w3_hwio=w3_hwio))
    ref = jax.block_until_ready(ref)
    err = float(np.max(np.abs(np.asarray(out) - np.asarray(ref))))
    # bf16 MXU operands vs f32 reference -> allow a slightly looser tolerance.
    assert np.allclose(np.asarray(out), np.asarray(ref), rtol=5e-2, atol=5e-2), err

    print("KERNEL_OK")
</pallas_src>

<mosaic_0001>
module attributes {stable_mosaic.version = 11 : i64} {
  func.func @_stage1_kernel(%arg0: i32, %arg1: memref<48x36xbf16, #tpu.memory_space<vmem>>, %arg2: memref<36x4xbf16, #tpu.memory_space<vmem>>, %arg3: memref<1x4xf32, #tpu.memory_space<vmem>>, %arg4: memref<36x8xbf16, #tpu.memory_space<vmem>>, %arg5: memref<1x8xf32, #tpu.memory_space<vmem>>, %arg6: memref<48x4xf32, #tpu.memory_space<vmem>>, %arg7: memref<48x8xf32, #tpu.memory_space<vmem>>, %arg8: memref<1x4xf32, #tpu.memory_space<vmem>>, %arg9: memref<1x4xf32, #tpu.memory_space<vmem>>) attributes {dimension_semantics = [#tpu.dimension_semantics<arbitrary>], iteration_bounds = array<i64: 3>, scalar_prefetch = 0 : i64, scratch_operands = 0 : i64, tpu.core_type = #tpu.core_type<tc>, window_params = [{transform_indices = @transform_0, window_bounds = array<i64: 48, 36>}, {pipeline_mode = #tpu.pipeline_mode<synchronous>, transform_indices = @transform_1, window_bounds = array<i64: 36, 4>}, {pipeline_mode = #tpu.pipeline_mode<synchronous>, transform_indices = @transform_2, window_bounds = array<i64: 1, 4>}, {pipeline_mode = #tpu.pipeline_mode<synchronous>, transform_indices = @transform_3, window_bounds = array<i64: 36, 8>}, {pipeline_mode = #tpu.pipeline_mode<synchronous>, transform_indices = @transform_4, window_bounds = array<i64: 1, 8>}, {transform_indices = @transform_5, window_bounds = array<i64: 48, 4>}, {transform_indices = @transform_6, window_bounds = array<i64: 48, 8>}, {pipeline_mode = #tpu.pipeline_mode<synchronous>, transform_indices = @transform_7, window_bounds = array<i64: 1, 4>}, {pipeline_mode = #tpu.pipeline_mode<synchronous>, transform_indices = @transform_8, window_bounds = array<i64: 1, 4>}]} {
    %c0 = arith.constant 0 : index
    %c0_0 = arith.constant 0 : index
    %0 = vector.load %arg1[%c0, %c0_0] : memref<48x36xbf16, #tpu.memory_space<vmem>>, vector<48x36xbf16>
    %c0_1 = arith.constant 0 : index
    %c0_2 = arith.constant 0 : index
    %1 = vector.load %arg2[%c0_1, %c0_2] : memref<36x4xbf16, #tpu.memory_space<vmem>>, vector<36x4xbf16>
    %cst = arith.constant dense<0.000000e+00> : vector<48x4xf32>
    %2 = tpu.matmul %0, %1, %cst {dimension_numbers = #tpu.dot_dimension_numbers<[1], [0], [0], [1], [0, 0, 1, 1], [], []>} : vector<48x36xbf16>, vector<36x4xbf16>, vector<48x4xf32> -> vector<48x4xf32>
    %c0_3 = arith.constant 0 : index
    %c0_4 = arith.constant 0 : index
    %3 = vector.load %arg3[%c0_3, %c0_4] : memref<1x4xf32, #tpu.memory_space<vmem>>, vector<1x4xf32>
    %4 = vector.broadcast %3 : vector<1x4xf32> to vector<48x4xf32>
    %5 = arith.addf %2, %4 : vector<48x4xf32>
    %c0_5 = arith.constant 0 : index
    %c0_6 = arith.constant 0 : index
    %6 = vector.load %arg4[%c0_5, %c0_6] : memref<36x8xbf16, #tpu.memory_space<vmem>>, vector<36x8xbf16>
    %cst_7 = arith.constant dense<0.000000e+00> : vector<48x8xf32>
    %7 = tpu.matmul %0, %6, %cst_7 {dimension_numbers = #tpu.dot_dimension_numbers<[1], [0], [0], [1], [0, 0, 1, 1], [], []>} : vector<48x36xbf16>, vector<36x8xbf16>, vector<48x8xf32> -> vector<48x8xf32>
    %c0_8 = arith.constant 0 : index
    %c0_9 = arith.constant 0 : index
    %8 = vector.load %arg5[%c0_8, %c0_9] : memref<1x8xf32, #tpu.memory_space<vmem>>, vector<1x8xf32>
    %9 = vector.broadcast %8 : vector<1x8xf32> to vector<48x8xf32>
    %10 = arith.addf %7, %9 : vector<48x8xf32>
    %c0_10 = arith.constant 0 : index
    %c0_11 = arith.constant 0 : index
    %11 = vector.load %arg6[%c0_10, %c0_11] : memref<48x4xf32, #tpu.memory_space<vmem>>, vector<48x4xf32>
    tpu.vector_store %arg6[%c0_10, %c0_11], %5 {strides = array<i32>} : memref<48x4xf32, #tpu.memory_space<vmem>>, vector<48x4xf32>,
    %c0_12 = arith.constant 0 : index
    %c0_13 = arith.constant 0 : index
    %12 = vector.load %arg7[%c0_12, %c0_13] : memref<48x8xf32, #tpu.memory_space<vmem>>, vector<48x8xf32>
    tpu.vector_store %arg7[%c0_12, %c0_13], %10 {strides = array<i32>} : memref<48x8xf32, #tpu.memory_space<vmem>>, vector<48x8xf32>,
    %c0_i32 = arith.constant 0 : i32
    %13 = arith.cmpi eq, %arg0, %c0_i32 : i32
    %14 = arith.extui %13 : i1 to i32
    %c0_i32_14 = arith.constant 0 : i32
    %15 = arith.cmpi ne, %14, %c0_i32_14 : i32
    scf.if %15 {
      %cst_25 = arith.constant 0.000000e+00 : f32
      %36 = vector.broadcast %cst_25 : f32 to vector<1x4xf32>
      %c0_26 = arith.constant 0 : index
      %c0_27 = arith.constant 0 : index
      %37 = vector.load %arg8[%c0_26, %c0_27] : memref<1x4xf32, #tpu.memory_space<vmem>>, vector<1x4xf32>
      tpu.vector_store %arg8[%c0_26, %c0_27], %36 {strides = array<i32>} : memref<1x4xf32, #tpu.memory_space<vmem>>, vector<1x4xf32>,
      %cst_28 = arith.constant 0.000000e+00 : f32
      %38 = vector.broadcast %cst_28 : f32 to vector<1x4xf32>
      %c0_29 = arith.constant 0 : index
      %c0_30 = arith.constant 0 : index
      %39 = vector.load %arg9[%c0_29, %c0_30] : memref<1x4xf32, #tpu.memory_space<vmem>>, vector<1x4xf32>
      tpu.vector_store %arg9[%c0_29, %c0_30], %38 {strides = array<i32>} : memref<1x4xf32, #tpu.memory_space<vmem>>, vector<1x4xf32>,
    } else {
    }
    %c48_i32 = arith.constant 48 : i32
    %16 = arith.muli %arg0, %c48_i32 : i32
    %17 = tpu.iota {dimensions = array<i32: 0>} : vector<48x4xi32>
    %18 = vector.broadcast %16 : i32 to vector<48x4xi32>
    %19 = arith.addi %17, %18 : vector<48x4xi32>
    %c128_i32 = arith.constant 128 : i32
    %20 = vector.broadcast %c128_i32 : i32 to vector<48x4xi32>
    %21 = arith.cmpi slt, %19, %20 : vector<48x4xi32>
    %22 = arith.extui %21 : vector<48x4xi1> to vector<48x4xi32>
    %23 = arith.sitofp %22 : vector<48x4xi32> to vector<48x4xf32>
    %24 = arith.mulf %5, %23 : vector<48x4xf32>
    %c0_15 = arith.constant 0 : index
    %c0_16 = arith.constant 0 : index
    %25 = vector.load %arg8[%c0_15, %c0_16] : memref<1x4xf32, #tpu.memory_space<vmem>>, vector<1x4xf32>
    %cst_17 = arith.constant dense<0.000000e+00> : vector<4xf32>
    %26 = vector.multi_reduction <add>, %24, %cst_17 [0] : vector<48x4xf32> to vector<4xf32>
    %27 = vector.shape_cast %26 : vector<4xf32> to vector<1x4xf32>
    %28 = arith.addf %25, %27 : vector<1x4xf32>
    %c0_18 = arith.constant 0 : index
    %c0_19 = arith.constant 0 : index
    %29 = vector.load %arg8[%c0_18, %c0_19] : memref<1x4xf32, #tpu.memory_space<vmem>>, vector<1x4xf32>
    tpu.vector_store %arg8[%c0_18, %c0_19], %28 {strides = array<i32>} : memref<1x4xf32, #tpu.memory_space<vmem>>, vector<1x4xf32>,
    %c0_20 = arith.constant 0 : index
    %c0_21 = arith.constant 0 : index
    %30 = vector.load %arg9[%c0_20, %c0_21] : memref<1x4xf32, #tpu.memory_space<vmem>>, vector<1x4xf32>
    %31 = arith.mulf %24, %5 : vector<48x4xf32>
    %cst_22 = arith.constant dense<0.000000e+00> : vector<4xf32>
    %32 = vector.multi_reduction <add>, %31, %cst_22 [0] : vector<48x4xf32> to vector<4xf32>
    %33 = vector.shape_cast %32 : vector<4xf32> to vector<1x4xf32>
    %34 = arith.addf %30, %33 : vector<1x4xf32>
    %c0_23 = arith.constant 0 : index
    %c0_24 = arith.constant 0 : index
    %35 = vector.load %arg9[%c0_23, %c0_24] : memref<1x4xf32, #tpu.memory_space<vmem>>, vector<1x4xf32>
    tpu.vector_store %arg9[%c0_23, %c0_24], %34 {strides = array<i32>} : memref<1x4xf32, #tpu.memory_space<vmem>>, vector<1x4xf32>,
    return
  }
  func.func @transform_0(%arg0: i32) -> (i32, i32) {
    %c0_i32 = arith.constant 0 : i32
    %c0_i32_0 = arith.constant 0 : i32
    return %arg0, %c0_i32 : i32, i32
  }
  func.func @transform_1(%arg0: i32) -> (i32, i32) {
    %c0_i32 = arith.constant 0 : i32
    %c0_i32_0 = arith.constant 0 : i32
    %c0_i32_1 = arith.constant 0 : i32
    return %c0_i32, %c0_i32_0 : i32, i32
  }
  func.func @transform_2(%arg0: i32) -> (i32, i32) {
    %c0_i32 = arith.constant 0 : i32
    %c0_i32_0 = arith.constant 0 : i32
    %c0_i32_1 = arith.constant 0 : i32
    return %c0_i32, %c0_i32_0 : i32, i32
  }
  func.func @transform_3(%arg0: i32) -> (i32, i32) {
    %c0_i32 = arith.constant 0 : i32
    %c0_i32_0 = arith.constant 0 : i32
    %c0_i32_1 = arith.constant 0 : i32
    return %c0_i32, %c0_i32_0 : i32, i32
  }
  func.func @transform_4(%arg0: i32) -> (i32, i32) {
    %c0_i32 = arith.constant 0 : i32
    %c0_i32_0 = arith.constant 0 : i32
    %c0_i32_1 = arith.constant 0 : i32
    return %c0_i32, %c0_i32_0 : i32, i32
  }
  func.func @transform_5(%arg0: i32) -> (i32, i32) {
    %c0_i32 = arith.constant 0 : i32
    %c0_i32_0 = arith.constant 0 : i32
    return %arg0, %c0_i32 : i32, i32
  }
  func.func @transform_6(%arg0: i32) -> (i32, i32) {
    %c0_i32 = arith.constant 0 : i32
    %c0_i32_0 = arith.constant 0 : i32
    return %arg0, %c0_i32 : i32, i32
  }
  func.func @transform_7(%arg0: i32) -> (i32, i32) {
    %c0_i32 = arith.constant 0 : i32
    %c0_i32_0 = arith.constant 0 : i32
    %c0_i32_1 = arith.constant 0 : i32
    return %c0_i32, %c0_i32_0 : i32, i32
  }
  func.func @transform_8(%arg0: i32) -> (i32, i32) {
    %c0_i32 = arith.constant 0 : i32
    %c0_i32_0 = arith.constant 0 : i32
    %c0_i32_1 = arith.constant 0 : i32
    return %c0_i32, %c0_i32_0 : i32, i32
  }
}

</mosaic_0001>

<bundles_post_ra>
// kernel: tpu_custom_call.1
= control target key start
LH: loop header
LB: loop body
LE: loop exit
PB: predicated region body
PF: predicated region fallthrough
CT: control target
= control target key end

     0   :  { %14 = vsyncpa [#allocation3], 0  ;;  %s1048_s0 = inlined_call_operand.vmem [shape: bf16[144,36], index: 0, kind: input, shape index: {}]   ;;  %s1049_s1 = inlined_call_operand.vmem [shape: bf16[36,4], index: 1, kind: input, shape index: {}]   ;;  %s1050_s2 = inlined_call_operand.vmem [shape: f32[1,4], index: 2, kind: input, shape index: {}]   ;;  %s1051_s3 = inlined_call_operand.vmem [shape: bf16[36,8], index: 3, kind: input, shape index: {}]   ;;  %s1052_s4 = inlined_call_operand.vmem [shape: f32[1,8], index: 4, kind: input, shape index: {}]   ;;  %s1053_s5 = inlined_call_operand.vmem [shape: f32[144,4], index: 5, kind: output, shape index: {0}]   ;;  %s1054_s6 = inlined_call_operand.vmem [shape: f32[144,8], index: 6, kind: output, shape index: {1}]   ;;  %s1055_s7 = inlined_call_operand.hbm [shape: f32[1,4], index: 7, kind: output, shape index: {2}]   ;;  %s1056_s8 = inlined_call_operand.hbm [shape: f32[1,4], index: 8, kind: output, shape index: {3}]  }
   0x1   :  { %15 = vsyncpa [#allocation5], 0  ;;  %s916_s27 = smov 0  }
   0x2 LB: > { %s922_s28 = sadd.s32 4294967295, %s865_s27   ;;  %p705_p0 = scmp.ge.s32.totalorder %s865_s27, 1  ;;  %s865_s27 = sphi %s916_s27, %s21_s27  }
   0x3   : > { %p262_p1 = scmp.lt.s32.totalorder %s865_s27, 4 }
   0x5   : > { %p263_p2 = pnand %p705_p0, %p262_p1 }
   0x6   : > { %s301_s11 = smul.u32 (!%p263_p2), 6, %s922_s28  ;;  %p743_p4 = scmp.ne.s32.totalorder (!%p263_p2), %s922_s28, 0 }
   0x7   : > { %266 = sbr.rel (%p263_p2) target bundleno = 238 (0xee), region = 40 }
   0x8   : > { %p302_p3 = scmp.lt.s32.totalorder (!%p263_p2), %s301_s11, 17 }
   0xc   : > { %v330_v0 = vld [vmem:[%s1049_s1 + $0x10] sm:$0x3]  ;;  %vm375_vm0 = vcmask 1041408   ;;  %s1058_s11 = smov (!%p302_p3, %s301_s11), 17  ;;  %v760_v8 = vld [vmem:[%s1049_s1 + $0x8] sm:$0xff]  ;;  %v759_v10 = vld [vmem:[%s1049_s1] sm:$0xff] }
   0xd   : > { %v407_v1 = vld [vmem:[%s1051_s3 + $0x10] sm:$0x3]  ;;  %v359_v2 = vunpack.c.l.b16 %v330_v0  ;;  %v762_v9 = vld [vmem:[%s1051_s3 + $0x8] sm:$0xff]  ;;  %s706_s16 = sshll.u32 %s1058_s11, 2  ;;  %v761_v11 = vld [vmem:[%s1051_s3] sm:$0xff]  ;;  %vm365_vm1 = vcmask 293888  }
   0xe   : > { %v421_v3 = vunpack.c.l.b16 %v407_v1  ;;  %s305_s23 = scalar_lea.vmem %s1048_s0, %s706_s16  ;;  %s707_s24 = sshll.u32 %s1058_s11, 3  ;;  %v793_v15 = vld [vmem:[%s1050_s2] ss:$0 sm:$0xff]  ;;  %vm454_vm2 = vcmask 31744   ;;  %vm461_vm3 = vcmask 64512  }
   0xf   : > { %v362_v4 = vpack.c.b16 %v359_v2, %v359_v2  ;;  %v757_v12 = vld [vmem:[%s305_s23 + $0x8] sm:$0xff]  ;;  %v756_v13 = vld [vmem:[%s305_s23] sm:$0xff]  ;;  %v758_v14 = vld [vmem:[%s305_s23 + $0x10] sm:$0xff]  ;;  %s963_s12 = scalar_lea.vmem %s1053_s5, %s707_s24  ;;  %s968_s14 = scalar_lea.vmem %s1054_s6, %s707_s24 }
  0x10   : > { %v424_v5 = vpack.c.b16 %v421_v3, %v421_v3  ;;  %v794_v16 = vld [vmem:[%s1052_s4] ss:$0 sm:$0xff] }
  0x11   : > { %v377_v6 = vsel %vm375_vm0, %v362_v4, 0 }
  0x12   : > { %v428_v7 = vsel %vm375_vm0, %v424_v5, 0  ;;  %763 = vmatpush.bf16.msra.mxu2 %v377_v6  ;;  %384 = vmatpush.bf16.msra.mxu0 %v377_v6 }
  0x13   : > { %766 = vmatpush.bf16.msra.mxu3 %v428_v7  ;;  %435 = vmatpush.bf16.msra.mxu1 %v428_v7 }
  0x16   : > { %764 = vmatpush.bf16.msra.mxu2 %v760_v8  ;;  %385 = vmatpush.bf16.msra.mxu0 %v760_v8 }
  0x17   : > { %767 = vmatpush.bf16.msra.mxu3 %v762_v9  ;;  %436 = vmatpush.bf16.msra.mxu1 %v762_v9 }
  0x1a   : > { %765 = vmatpush.bf16.msra.mxu2 %v759_v10  ;;  %386 = vmatpush.bf16.msra.mxu0 %v759_v10 }
  0x1b   : > { %768 = vmatpush.bf16.msra.mxu3 %v761_v11  ;;  %437 = vmatpush.bf16.msra.mxu1 %v761_v11 }
  0x1d   : > { %730 = vmatmul.msk.bf16.vlgmr.msra.gmra.mxu2 %vm365_vm1, %v757_v12  ;;  %729 = vmatmul.msk.bf16.vlgmr.msra.gmra.mxu0 %vm365_vm1, %v756_v13 }
  0x1e   : > { %741 = vmatmul.msk.bf16.vlgmr.msra.gmra.mxu3 %vm365_vm1, %v757_v12  ;;  %740 = vmatmul.msk.bf16.vlgmr.msra.gmra.mxu1 %vm365_vm1, %v756_v13 }
  0x2d   : > { %731 = vmatmul.msk.bf16.gmra.mxu2 %vm365_vm1, %v758_v14 }
  0x2e   : > { %742 = vmatmul.msk.bf16.gmra.mxu3 %vm365_vm1, %v758_v14 }
  0x9a   : > { %v388_v17 = vpop.f32.mrf.mxu0 }
  0x9b   : > { %v439_v18 = vpop.f32.mrf.mxu1  ;;  %v958_v19 = vadd.f32 %v793_v15, %v388_v17 }
  0x9c   : > { %v440_v20 = vadd.f32 %v794_v16, %v439_v18 }
  0x9d   : > { %455 = vst.msk [vmem:[%s963_s12] sm:$0xff] %vm454_vm2, %v958_v19 }
  0x9e   : > { %462 = vst.msk [vmem:[%s968_s14] sm:$0xff] %vm461_vm3, %v440_v20 }
  0xa0   : > { %v393_v21 = vpop.f32.mrf.mxu2 }
  0xa1   : > { %v444_v22 = vpop.f32.mrf.mxu3  ;;  %v975_v23 = vadd.f32 %v793_v15, %v393_v21 }
  0xa2   : > { %v445_v24 = vadd.f32 %v794_v16, %v444_v22  ;;  %v390_v25 = vpop.f32.mrf.mxu0 }
  0xa3   : > { %457 = vst.msk [vmem:[%s963_s12 + $0x10] sm:$0xff] %vm454_vm2, %v975_v23  ;;  %v441_v26 = vpop.f32.mrf.mxu1  ;;  %v982_v27 = vadd.f32 %v793_v15, %v390_v25 }
  0xa4   : > { %464 = vst.msk [vmem:[%s968_s14 + $0x10] sm:$0xff] %vm461_vm3, %v445_v24  ;;  %v442_v28 = vadd.f32 %v794_v16, %v441_v26 }
  0xa5   : > { %456 = vst.msk [vmem:[%s963_s12 + $0x8] sm:$0xff] %vm454_vm2, %v982_v27 }
  0xa6   : > { %463 = vst.msk [vmem:[%s968_s14 + $0x8] sm:$0xff] %vm461_vm3, %v442_v28 }
  0xa8   : > { %v395_v29 = vpop.f32.mrf.mxu2 }
  0xa9   : > { %v446_v30 = vpop.f32.mrf.mxu3  ;;  %v989_v31 = vadd.f32 %v793_v15, %v395_v29 }
  0xaa   : > { %v447_v32 = vadd.f32 %v794_v16, %v446_v30 }
  0xab   : > { %458 = vst.msk [vmem:[%s963_s12 + $0x18] sm:$0xff] %vm454_vm2, %v989_v31 }
  0xac   : > { %465 = vst.msk [vmem:[%s968_s14 + $0x18] sm:$0xff] %vm461_vm3, %v447_v32 }
  0xb0   : > { %v398_v33 = vpop.f32.mrf.mxu2 }
  0xb1   : > { %v449_v34 = vpop.f32.mrf.mxu3  ;;  %v399_v35 = vadd.f32 %v793_v15, %v398_v33 }
  0xb2   : > { %v450_v36 = vadd.f32 %v794_v16, %v449_v34 }
  0xb3   : > { %459 = vst.msk [vmem:[%s963_s12 + $0x20] sm:$0xff] %vm454_vm2, %v399_v35 }
  0xb4   : > { %466 = vst.msk [vmem:[%s968_s14 + $0x20] sm:$0xff] %vm461_vm3, %v450_v36 }
  0xb8   : > { %v400_v37 = vpop.f32.mrf.mxu2  ;;  %471 = sbr.rel (%p743_p4) target bundleno = 192 (0xc0), region = 44 }
  0xb9   : > { %v451_v38 = vpop.f32.mrf.mxu3  ;;  %v401_v39 = vadd.f32 %v793_v15, %v400_v37 }
  0xba   : > { %v452_v40 = vadd.f32 %v794_v16, %v451_v38 }
  0xbb   : > { %460 = vst.msk [vmem:[%s963_s12 + $0x28] sm:$0xff] %vm454_vm2, %v401_v39 }
  0xbc   : > { %467 = vst.msk [vmem:[%s968_s14 + $0x28] sm:$0xff] %vm461_vm3, %v452_v40 }
  0xbd   : > { %vm472_vm4 = vcmask 24576   ;;  %v867_v41 = vmov 0.0  }
  0xbe   : > { %473 = vst.msk [vmem:[#allocation2] sm:$0x1] %vm472_vm4, %v867_v41 }
  0xbf   : > { %474 = vst.msk [vmem:[#allocation4] sm:$0x1] %vm472_vm4, %v867_v41 }
  0xc0 PF: > { %s475_s15 = smul.u32 48, %s922_s28  ;;  %v476_v42 = vlaneseq  ;;  %v868_v56 = vmov 0.0   ;;  %s869_s16 = smov [#allocation2]   ;;  %vm533_vm11 = vcmask 24576  }
  0xc1   : > { %s585_s17 = sshll.u32 %s869_s16, 4  ;;  %s587_s20 = sshll.u32 %s1055_s7, 4  ;;  %s586_s17 = int_to_ptr.vmem [resolvable:$true] %s585_s17  ;;  %s588_s20 = int_to_ptr.hbm [resolvable:$true] %s587_s20 }
  0xc2   : > { %v477_v43 = vshrl.u32 %v476_v42, 7  ;;  %v483_v44 = vstv %s475_s15  ;;  %p777_p5 = scmp.eq.s32.totalorder %s922_s28, 2  ;;  %s870_s21 = smov [#allocation4]  }
  0xc3   : > { %s597_s22 = sshll.u32 %s870_s21, 4  ;;  %s599_s25 = sshll.u32 %s1056_s8, 4  ;;  %s598_s22 = int_to_ptr.vmem [resolvable:$true] %s597_s22  ;;  %s600_s25 = int_to_ptr.hbm [resolvable:$true] %s599_s25 }
  0xc4   : > { %v478_v45 = vadd.s32 8, %v477_v43  ;;  %v479_v46 = vadd.s32 16, %v477_v43  ;;  %v480_v47 = vadd.s32 24, %v477_v43  ;;  %v481_v48 = vadd.s32 32, %v477_v43 }
  0xc5   : > { %v482_v49 = vadd.s32 40, %v477_v43  ;;  %v484_v50 = vadd.s32 %v483_v44, %v477_v43  ;;  %v514_v41 = vld [vmem:[#allocation2] sm:$0x1] }
  0xc6   : > { %v485_v51 = vadd.s32 %v483_v44, %v478_v45  ;;  %v486_v52 = vadd.s32 %v483_v44, %v479_v46  ;;  %v487_v53 = vadd.s32 %v483_v44, %v480_v47  ;;  %v488_v54 = vadd.s32 %v483_v44, %v481_v48  ;;  %v535_v46 = vld [vmem:[#allocation4] sm:$0x1] }
  0xc7   : > { %v489_v55 = vadd.s32 %v483_v44, %v482_v49  ;;  %vm490_vm5 = vcmp.lt.s32.totalorder %v484_v50, 128 }
  0xc8   : > { %vm491_vm6 = vcmp.lt.s32.totalorder %v485_v51, 128  ;;  %vm492_vm7 = vcmp.lt.s32.totalorder %v486_v52, 128  ;;  %vm493_vm8 = vcmp.lt.s32.totalorder %v487_v53, 128  ;;  %vm494_vm9 = vcmp.lt.s32.totalorder %v488_v54, 128 }
  0xc9   : > { %vm495_vm10 = vcmp.lt.s32.totalorder %v489_v55, 128  ;;  %v744_v57 = vsel %vm490_vm5, 1.0, %v868_v56  ;;  %v745_v58 = vsel %vm491_vm6, 1.0, %v868_v56  ;;  %v746_v59 = vsel %vm492_vm7, 1.0, %v868_v56 }
  0xca   : > { %v747_v60 = vsel %vm493_vm8, 1.0, %v868_v56  ;;  %v748_v61 = vsel %vm494_vm9, 1.0, %v868_v56  ;;  %v508_v62 = vmul.f32 %v744_v57, %v958_v19  ;;  %v749_v63 = vsel %vm495_vm10, 1.0, %v868_v56 }
  0xcb   : > { %v509_v0 = vmul.f32 %v745_v58, %v982_v27  ;;  %v510_v1 = vmul.f32 %v746_v59, %v975_v23  ;;  %v511_v2 = vmul.f32 %v747_v60, %v989_v31  ;;  %v512_v3 = vmul.f32 %v748_v61, %v399_v35 }
  0xcc   : > { %v515_v4 = vsel %vm454_vm2, %v508_v62, 0.0  ;;  %v536_v5 = vmul.f32 %v508_v62, %v958_v19  ;;  %v513_v8 = vmul.f32 %v749_v63, %v401_v39 }
  0xcd   : > { %v516_v6 = vsel %vm454_vm2, %v509_v0, 0.0  ;;  %v518_v7 = vsel %vm454_vm2, %v510_v1, 0.0  ;;  %v537_v10 = vmul.f32 %v509_v0, %v982_v27  ;;  %v538_v11 = vmul.f32 %v510_v1, %v975_v23 }
  0xce   : > { %v517_v9 = vadd.f32 %v516_v6, %v515_v4  ;;  %v520_v12 = vsel %vm454_vm2, %v511_v2, 0.0  ;;  %v539_v13 = vmul.f32 %v511_v2, %v989_v31  ;;  %v542_v14 = vsel %vm454_vm2, %v536_v5, 0.0 }
  0xcf   : > { %v540_v16 = vmul.f32 %v512_v3, %v399_v35  ;;  %v543_v17 = vsel %vm454_vm2, %v537_v10, 0.0  ;;  %v545_v18 = vsel %vm454_vm2, %v538_v11, 0.0  ;;  %v522_v19 = vsel %vm454_vm2, %v512_v3, 0.0 }
  0xd0   : > { %v519_v15 = vadd.f32 %v518_v7, %v517_v9  ;;  %v544_v20 = vadd.f32 %v543_v17, %v542_v14  ;;  %v541_v22 = vmul.f32 %v513_v8, %v401_v39  ;;  %v547_v24 = vsel %vm454_vm2, %v539_v13, 0.0 }
  0xd1   : > { %v524_v23 = vsel %vm454_vm2, %v513_v8, 0.0  ;;  %v549_v27 = vsel %vm454_vm2, %v540_v16, 0.0 }
  0xd2   : > { %v521_v21 = vadd.f32 %v520_v12, %v519_v15  ;;  %v546_v25 = vadd.f32 %v545_v18, %v544_v20  ;;  %v551_v30 = vsel %vm454_vm2, %v541_v22, 0.0 }
  0xd4   : > { %v523_v26 = vadd.f32 %v522_v19, %v521_v21  ;;  %v548_v28 = vadd.f32 %v547_v24, %v546_v25 }
  0xd6   : > { %v525_v29 = vadd.f32 %v524_v23, %v523_v26  ;;  %v550_v31 = vadd.f32 %v549_v27, %v548_v28 }
  0xd8   : > { %v526_v32 = vrot.slane %v525_v29, 4  ;;  %v552_v33 = vadd.f32 %v551_v30, %v550_v31 }
  0xda   : > { %v527_v34 = vadd.f32 %v526_v32, %v525_v29  ;;  %v553_v35 = vrot.slane %v552_v33, 4 }
  0xdc   : > { %v528_v36 = vrot.slane %v527_v34, 2  ;;  %v554_v37 = vadd.f32 %v553_v35, %v552_v33 }
  0xde   : > { %v529_v38 = vadd.f32 %v528_v36, %v527_v34  ;;  %v555_v39 = vrot.slane %v554_v37, 2 }
  0xe0   : > { %v530_v40 = vrot.slane %v529_v38, 1  ;;  %v556_v42 = vadd.f32 %v555_v39, %v554_v37 }
  0xe2   : > { %v531_v43 = vadd.f32 %v530_v40, %v529_v38  ;;  %v557_v44 = vrot.slane %v556_v42, 1 }
  0xe4   : > { %v532_v45 = vadd.f32 %v531_v43, %v514_v41  ;;  %v558_v47 = vadd.f32 %v557_v44, %v556_v42 }
  0xe6   : > { %534 = vst.msk [vmem:[#allocation2] sm:$0x1] %vm533_vm11, %v532_v45  ;;  %v559_v48 = vadd.f32 %v558_v47, %v535_v46 }
  0xe7   : > { %770 = dma.vmem_to_hbm [thread:$0]  (%p777_p5), %s586_s17, 16, %s588_s20, [#allocation3]  }
  0xe8   : > { %560 = vst.msk [vmem:[#allocation4] sm:$0x1] %vm533_vm11, %v559_v48 }
  0xe9   : > { %772 = dma.vmem_to_hbm [thread:$0]  (%p777_p5), %s598_s22, 16, %s600_s25, [#allocation5]  }
  0xea   : > { %856 = dma.done.wait (%p777_p5), [#allocation3], 16  }
  0xeb   : > { %858 = vsyncadd (%p777_p5), [#allocation3], 4294967280 }
  0xec   : > { %860 = dma.done.wait (%p777_p5), [#allocation5], 16  }
  0xed   : > { %862 = vsyncadd (%p777_p5), [#allocation5], 4294967280 }
  0xee PF: > { %s21_s27 = sadd.s32 1, %s865_s27  }
  0xef   : > { %p18_p6 = scmp.ge.s32.totalorder %s21_s27, 5  }
  0xf1   :  { %20 = sbr.rel (!%p18_p6) target bundleno = 2 (0x2), region = 103 }
  0xf6   :  { %634 = vsyncpa [#allocation3], 1 }
  0xf7   :  { %636 = vsyncpa [#allocation3 + $0x1], 1 }
  0xf8   :  { %637 = vsyncpa [#allocation5], 1 }

</bundles_post_ra>
